<compile_context>
chip_gen: v7x
topology: tpu7x:2x2x1
jax: 0.10.0
libtpu: 0.0.40
codegen_flags: <defaults>
</compile_context>

<pallas_src>
import jax
import jax.numpy as jnp
from jax.experimental import pallas as pl
from jax.experimental.pallas import tpu as pltpu


def attention_kernel(z_ref, sel_ref, w1_ref, b1_ref, w2_ref, c_ref, o_ref):
    # z_ref  : (TB, Np, D)    chunk of TB batch rows (streamed, bf16)
    # sel_ref: (TB, TB*Np)    block-diagonal selector, padded cols zeroed (bf16)
    # w1_ref : (D, H)         l1.weight transposed (bf16, resident)
    # b1_ref : (1, H)         l1.bias (f32, resident)
    # w2_ref : (H, 1)         l2.weight column (f32, resident)
    # c_ref  : (1, 1)         ||w2||_1 score bound (f32, resident)
    # o_ref  : (TB, D)        output chunk (f32)
    TB, Np, D = z_ref.shape

    # Fold the batch chunk into the sublane axis: one big MXU matmul.
    # Np is padded to the sublane packing, so this reshape is tile-aligned.
    z2 = z_ref[...].reshape(TB * Np, D)                               # (TB*Np, D) bf16

    # ---- l1 + tanh (MXU matmul, f32 accumulate; EUP tanh) ----
    h = jnp.tanh(
        jnp.dot(z2, w1_ref[...], preferred_element_type=jnp.float32)
        + b1_ref[...]
    )                                                                 # (TB*Np, H) f32

    # ---- l2 (hidden -> 1, no bias) as an MXU matmul ----
    s = jnp.dot(h, w2_ref[...], preferred_element_type=jnp.float32)   # (TB*Np, 1) f32

    # ---- softmax over N + weighted sum via the resident selector ----
    # s - c <= 0 because |s| <= ||w2||_1 = c, so exp never overflows; the
    # constant shift cancels in the softmax ratio (exact semantics).
    e = jnp.exp(s - c_ref[...])                                       # (TB*Np, 1), in (0, 1]

    sel = sel_ref[...]                                                # (TB, TB*Np) bf16
    ez = e.astype(z2.dtype) * z2                                      # (TB*Np, D) bf16

    # numerator[b, :] = sum_n exp(s[b,n]-c) * z[b,n,:]   (MXU)
    # denominator[b]  = sum_n exp(s[b,n]-c)              (MXU)
    num = jnp.dot(sel, ez, preferred_element_type=jnp.float32)        # (TB, D)
    den = jnp.dot(sel, e.astype(sel.dtype),
                  preferred_element_type=jnp.float32)                 # (TB, 1)

    o_ref[...] = (num * pl.reciprocal(den, approx=True)).astype(o_ref.dtype)


def _vmem_capacity_bytes():
    """Detected per-core VMEM capacity; conservative fallback if unavailable."""
    try:
        return int(pltpu.get_tpu_info().vmem_capacity_bytes)
    except Exception:
        return 64 << 20  # assume the smallest (v7x) if we can't query


def _choose_block_batch(batch, n_tokens, feat, hidden, dtype_bytes, target_bytes,
                        sel_bytes_cap=2 << 20):
    """Batch-chunk size TB: largest divisor of `batch` under all caps.

    Caps (per performance review):
      * z tile <= target_bytes (generation-aware streaming tile size),
      * TB <= H (selector matmul FLOPs stay ~TB/H of the l1 matmul),
      * selector footprint TB*TB*N*dtype_bytes <= sel_bytes_cap,
      * >= 2 grid steps when batch permits (v7x: two TensorCores).
    """
    per_row = max(1, n_tokens * feat * dtype_bytes)
    cap = max(1, target_bytes // per_row)                       # z-tile byte cap
    cap = min(cap, max(8, hidden))                              # selector-FLOP cap
    sel_cap = int((sel_bytes_cap / max(1, n_tokens * dtype_bytes)) ** 0.5)
    cap = min(cap, max(1, sel_cap))                             # sel footprint cap
    if batch >= 16:
        cap = min(cap, batch // 2)                              # keep both v7x TCs busy
    if batch <= cap:
        return batch
    divisors = [d for d in range(1, min(batch, cap) + 1) if batch % d == 0]
    aligned = [d for d in divisors if d % 8 == 0]
    return aligned[-1] if aligned else divisors[-1]


def attention_forward(z, w1, b1, w2, *, block_batch=None,
                      compute_dtype=jnp.bfloat16):
    """z: (B, N, D); w1: (D, H); b1: (H,); w2: (H,).  Returns (B, D) float32."""
    B, N, D = z.shape
    H = w1.shape[1]
    dtype_bytes = jnp.dtype(compute_dtype).itemsize

    # Pad N to the sublane packing so the in-kernel reshape is tile-aligned.
    sub = 16 if dtype_bytes == 2 else 8
    Np = ((N + sub - 1) // sub) * sub
    if Np != N:
        z = jnp.pad(z, ((0, 0), (0, Np - N), (0, 0)))

    # Generation-aware VMEM budget and streaming tile target.
    vmem_cap = int(0.75 * _vmem_capacity_bytes())               # headroom (v7x: ~48 MiB)
    target_bytes = int(min(12 << 20, max(4 << 20, vmem_cap // 6)))

    TB = block_batch if block_batch is not None else _choose_block_batch(
        B, Np, D, H, dtype_bytes, target_bytes)
    assert B % TB == 0, f"block_batch={TB} must divide batch={B}"

    # --- grid-invariant operands, built once in the wrapper ---
    z_in = z.astype(compute_dtype)
    w1_in = w1.astype(compute_dtype)
    b1_2d = b1.reshape(1, H).astype(jnp.float32)
    w2_col = w2.reshape(H, 1).astype(jnp.float32)
    c = jnp.sum(jnp.abs(w2)).reshape(1, 1).astype(jnp.float32)  # |score| bound

    # Block-diagonal selector with padded-token columns zeroed (hoisted out of
    # the kernel; resident across the grid).
    col = jnp.arange(TB * Np, dtype=jnp.int32)
    row = jnp.arange(TB, dtype=jnp.int32)
    in_blk = (col[None, :] // Np) == row[:, None]
    valid = (col[None, :] % Np) < N
    sel = (in_blk & valid).astype(compute_dtype)                # (TB, TB*Np)

    # --- explicit VMEM budget from actual tile footprint (2x headroom) ---
    est = (
        2 * TB * Np * D * dtype_bytes                  # z tile, double-buffered
        + 2 * TB * D * 4                               # out tile, double-buffered
        + 2 * (D * H * dtype_bytes + 2 * H * 4         # w1, b1, w2
               + TB * TB * Np * dtype_bytes + 4)       # sel, c
        + TB * Np * (H * 4 + 8 + D * dtype_bytes)      # h, s/e, e*z2
        + TB * (D + 1) * 4                             # num, den
    )
    vmem_limit = int(min(vmem_cap, max(16 << 20, 2 * est)))

    # Advisory cost hint so XLA overlaps neighbours with this mem-bound call.
    cost = pl.CostEstimate(
        flops=int(2 * B * Np * (D * H + H + TB * D + TB)),
        transcendentals=int(B * Np * (H + 1)),
        bytes_accessed=int(B * Np * D * dtype_bytes + B * D * 4
                           + D * H * dtype_bytes + 2 * H * 4
                           + TB * TB * Np * dtype_bytes),
    )

    return pl.pallas_call(
        attention_kernel,
        out_shape=jax.ShapeDtypeStruct((B, D), jnp.float32),
        grid_spec=pltpu.PrefetchScalarGridSpec(
            num_scalar_prefetch=0,
            grid=(B // TB,),
            in_specs=[
                pl.BlockSpec((TB, Np, D), lambda i: (i, 0, 0)),      # z chunk (streamed)
                pl.BlockSpec((TB, TB * Np), lambda i: (0, 0)),       # selector (resident)
                pl.BlockSpec((D, H), lambda i: (0, 0)),              # l1 weight (resident)
                pl.BlockSpec((1, H), lambda i: (0, 0)),              # l1 bias
                pl.BlockSpec((H, 1), lambda i: (0, 0)),              # l2 weight column
                pl.BlockSpec((1, 1), lambda i: (0, 0)),              # score bound c
            ],
            out_specs=pl.BlockSpec((TB, D), lambda i: (i, 0)),
        ),
        compiler_params=pltpu.CompilerParams(
            # Batch-chunk axis is embarrassingly parallel -> megacore/v7x TCs
            # can split it; harmless no-op on single-core v5e/v6e.
            dimension_semantics=("parallel",),
            vmem_limit_bytes=vmem_limit,
        ),
        cost_estimate=cost,
    )(z_in, sel, w1_in, b1_2d, w2_col, c)


def attention_reference(z, w1, b1, w2):
    """Pure-JAX f32 reference mirroring the PyTorch forward."""
    w = jnp.einsum("bnd,dh->bnh", z, w1) + b1           # l1
    w = jnp.tanh(w)                                     # ac
    s = jnp.einsum("bnh,h->bn", w, w2)[..., None]       # l2 -> (B, N, 1)
    beta = jax.nn.softmax(s, axis=1)                    # softmax over dim=1
    return jnp.sum(beta * z, axis=1)                    # (B, D)


if __name__ == "__main__":
    # Small deterministic shapes: batch=2, seq=8, in_size=16, hidden=32.
    B, N, D, H = 2, 8, 16, 32

    key = jax.random.PRNGKey(0)
    kz, kw1, kb1, kw2 = jax.random.split(key, 4)

    z = jax.random.normal(kz, (B, N, D), dtype=jnp.float32)

    # Deterministic parameter init (mimics PyTorch Linear's uniform(+-1/sqrt(fan_in))).
    bound1 = 1.0 / (D ** 0.5)
    w1 = jax.random.uniform(kw1, (D, H), minval=-bound1, maxval=bound1, dtype=jnp.float32)
    b1 = jax.random.uniform(kb1, (H,), minval=-bound1, maxval=bound1, dtype=jnp.float32)
    bound2 = 1.0 / (H ** 0.5)
    w2 = jax.random.uniform(kw2, (H,), minval=-bound2, maxval=bound2, dtype=jnp.float32)

    out = jax.block_until_ready(attention_forward(z, w1, b1, w2))
    ref = attention_reference(z, w1, b1, w2)

    assert out.shape == (B, D)
    # bf16 streaming of z plus the approx softmax reciprocal loosen the
    # tolerance vs. the pure-f32 reference (accumulation itself is f32).
    err = jnp.max(jnp.abs(out - ref))
    assert jnp.allclose(out, ref, atol=3e-2, rtol=3e-2), f"max abs err = {err}"

    print("KERNEL_OK")
</pallas_src>

<mosaic_0001>
module attributes {stable_mosaic.version = 11 : i64} {
  func.func @attention_kernel(%arg0: i32, %arg1: memref<2x16x16xbf16, #tpu.memory_space<vmem>>, %arg2: memref<2x32xbf16, #tpu.memory_space<vmem>>, %arg3: memref<16x32xbf16, #tpu.memory_space<vmem>>, %arg4: memref<1x32xf32, #tpu.memory_space<vmem>>, %arg5: memref<32x1xf32, #tpu.memory_space<vmem>>, %arg6: memref<1x1xf32, #tpu.memory_space<vmem>>, %arg7: memref<2x16xf32, #tpu.memory_space<vmem>>) attributes {dimension_semantics = [#tpu.dimension_semantics<parallel>], iteration_bounds = array<i64: 1>, scalar_prefetch = 0 : i64, scratch_operands = 0 : i64, tpu.core_type = #tpu.core_type<tc>, window_params = [{transform_indices = @transform_0, window_bounds = array<i64: 2, 16, 16>}, {pipeline_mode = #tpu.pipeline_mode<synchronous>, transform_indices = @transform_1, window_bounds = array<i64: 2, 32>}, {pipeline_mode = #tpu.pipeline_mode<synchronous>, transform_indices = @transform_2, window_bounds = array<i64: 16, 32>}, {pipeline_mode = #tpu.pipeline_mode<synchronous>, transform_indices = @transform_3, window_bounds = array<i64: 1, 32>}, {pipeline_mode = #tpu.pipeline_mode<synchronous>, transform_indices = @transform_4, window_bounds = array<i64: 32, 1>}, {pipeline_mode = #tpu.pipeline_mode<synchronous>, transform_indices = @transform_5, window_bounds = array<i64: 1, 1>}, {transform_indices = @transform_6, window_bounds = array<i64: 2, 16>}]} {
    %c0 = arith.constant 0 : index
    %c0_0 = arith.constant 0 : index
    %c0_1 = arith.constant 0 : index
    %0 = vector.load %arg1[%c0, %c0_0, %c0_1] : memref<2x16x16xbf16, #tpu.memory_space<vmem>>, vector<2x16x16xbf16>
    %1 = vector.shape_cast %0 : vector<2x16x16xbf16> to vector<32x16xbf16>
    %c0_2 = arith.constant 0 : index
    %c0_3 = arith.constant 0 : index
    %2 = vector.load %arg3[%c0_2, %c0_3] : memref<16x32xbf16, #tpu.memory_space<vmem>>, vector<16x32xbf16>
    %cst = arith.constant dense<0.000000e+00> : vector<32x32xf32>
    %3 = tpu.matmul %1, %2, %cst {dimension_numbers = #tpu.dot_dimension_numbers<[1], [0], [0], [1], [0, 0, 1, 1], [], []>} : vector<32x16xbf16>, vector<16x32xbf16>, vector<32x32xf32> -> vector<32x32xf32>
    %c0_4 = arith.constant 0 : index
    %c0_5 = arith.constant 0 : index
    %4 = vector.load %arg4[%c0_4, %c0_5] : memref<1x32xf32, #tpu.memory_space<vmem>>, vector<1x32xf32>
    %5 = vector.broadcast %4 : vector<1x32xf32> to vector<32x32xf32>
    %6 = arith.addf %3, %5 : vector<32x32xf32>
    %7 = math.tanh %6 : vector<32x32xf32>
    %c0_6 = arith.constant 0 : index
    %c0_7 = arith.constant 0 : index
    %8 = vector.load %arg5[%c0_6, %c0_7] : memref<32x1xf32, #tpu.memory_space<vmem>>, vector<32x1xf32>
    %cst_8 = arith.constant dense<0.000000e+00> : vector<32x1xf32>
    %9 = tpu.matmul %7, %8, %cst_8 {dimension_numbers = #tpu.dot_dimension_numbers<[1], [0], [0], [1], [0, 0, 1, 1], [], []>} : vector<32x32xf32>, vector<32x1xf32>, vector<32x1xf32> -> vector<32x1xf32>
    %c0_9 = arith.constant 0 : index
    %c0_10 = arith.constant 0 : index
    %10 = vector.load %arg6[%c0_9, %c0_10] : memref<1x1xf32, #tpu.memory_space<vmem>>, vector<1x1xf32>
    %11 = vector.broadcast %10 : vector<1x1xf32> to vector<32x1xf32>
    %12 = arith.subf %9, %11 : vector<32x1xf32>
    %13 = math.exp %12 : vector<32x1xf32>
    %c0_11 = arith.constant 0 : index
    %c0_12 = arith.constant 0 : index
    %14 = vector.load %arg2[%c0_11, %c0_12] : memref<2x32xbf16, #tpu.memory_space<vmem>>, vector<2x32xbf16>
    %15 = arith.truncf %13 : vector<32x1xf32> to vector<32x1xbf16>
    %16 = vector.broadcast %15 : vector<32x1xbf16> to vector<32x16xbf16>
    %17 = arith.mulf %16, %1 : vector<32x16xbf16>
    %cst_13 = arith.constant dense<0.000000e+00> : vector<2x16xf32>
    %18 = tpu.matmul %14, %17, %cst_13 {dimension_numbers = #tpu.dot_dimension_numbers<[1], [0], [0], [1], [0, 0, 1, 1], [], []>} : vector<2x32xbf16>, vector<32x16xbf16>, vector<2x16xf32> -> vector<2x16xf32>
    %19 = arith.truncf %13 : vector<32x1xf32> to vector<32x1xbf16>
    %cst_14 = arith.constant dense<0.000000e+00> : vector<2x1xf32>
    %20 = tpu.matmul %14, %19, %cst_14 {dimension_numbers = #tpu.dot_dimension_numbers<[1], [0], [0], [1], [0, 0, 1, 1], [], []>} : vector<2x32xbf16>, vector<32x1xbf16>, vector<2x1xf32> -> vector<2x1xf32>
    %21 = tpu.reciprocal %20 {approx = true} : vector<2x1xf32> -> vector<2x1xf32>
    %22 = vector.broadcast %21 : vector<2x1xf32> to vector<2x16xf32>
    %23 = arith.mulf %18, %22 : vector<2x16xf32>
    %c0_15 = arith.constant 0 : index
    %c0_16 = arith.constant 0 : index
    %24 = vector.load %arg7[%c0_15, %c0_16] : memref<2x16xf32, #tpu.memory_space<vmem>>, vector<2x16xf32>
    tpu.vector_store %arg7[%c0_15, %c0_16], %23 {strides = array<i32>} : memref<2x16xf32, #tpu.memory_space<vmem>>, vector<2x16xf32>,
    return
  }
  func.func @transform_0(%arg0: i32) -> (i32, i32, i32) {
    %c0_i32 = arith.constant 0 : i32
    %c0_i32_0 = arith.constant 0 : i32
    %c0_i32_1 = arith.constant 0 : i32
    return %arg0, %c0_i32, %c0_i32_0 : i32, i32, i32
  }
  func.func @transform_1(%arg0: i32) -> (i32, i32) {
    %c0_i32 = arith.constant 0 : i32
    %c0_i32_0 = arith.constant 0 : i32
    %c0_i32_1 = arith.constant 0 : i32
    return %c0_i32, %c0_i32_0 : i32, i32
  }
  func.func @transform_2(%arg0: i32) -> (i32, i32) {
    %c0_i32 = arith.constant 0 : i32
    %c0_i32_0 = arith.constant 0 : i32
    %c0_i32_1 = arith.constant 0 : i32
    return %c0_i32, %c0_i32_0 : i32, i32
  }
  func.func @transform_3(%arg0: i32) -> (i32, i32) {
    %c0_i32 = arith.constant 0 : i32
    %c0_i32_0 = arith.constant 0 : i32
    %c0_i32_1 = arith.constant 0 : i32
    return %c0_i32, %c0_i32_0 : i32, i32
  }
  func.func @transform_4(%arg0: i32) -> (i32, i32) {
    %c0_i32 = arith.constant 0 : i32
    %c0_i32_0 = arith.constant 0 : i32
    %c0_i32_1 = arith.constant 0 : i32
    return %c0_i32, %c0_i32_0 : i32, i32
  }
  func.func @transform_5(%arg0: i32) -> (i32, i32) {
    %c0_i32 = arith.constant 0 : i32
    %c0_i32_0 = arith.constant 0 : i32
    %c0_i32_1 = arith.constant 0 : i32
    return %c0_i32, %c0_i32_0 : i32, i32
  }
  func.func @transform_6(%arg0: i32) -> (i32, i32) {
    %c0_i32 = arith.constant 0 : i32
    %c0_i32_0 = arith.constant 0 : i32
    return %arg0, %c0_i32 : i32, i32
  }
}

</mosaic_0001>

<bundles_post_ra>
// kernel: tpu_custom_call.1
= control target key start
LH: loop header
LB: loop body
LE: loop exit
PB: predicated region body
PF: predicated region fallthrough
CT: control target
= control target key end

     0   :  { %s580_s0 = inlined_call_operand.vmem [shape: bf16[2,16,16], index: 0, kind: input, shape index: {}]   ;;  %s581_s1 = inlined_call_operand.vmem [shape: bf16[2,32], index: 1, kind: input, shape index: {}]   ;;  %s582_s2 = inlined_call_operand.vmem [shape: bf16[16,32], index: 2, kind: input, shape index: {}]   ;;  %s583_s3 = inlined_call_operand.vmem [shape: f32[1,32], index: 3, kind: input, shape index: {}]   ;;  %s584_s4 = inlined_call_operand.vmem [shape: f32[32,1], index: 4, kind: input, shape index: {}]   ;;  %s585_s5 = inlined_call_operand.<no memory space> [shape: f32[1,1], index: 5, kind: input, shape index: {}]   ;;  %s586_s6 = inlined_call_operand.hbm [shape: f32[2,16], index: 6, kind: output, shape index: {}]  }
   0x1   :  { %v11_v0 = vstv %s585_s5 }
   0x2   :  { %12 = vst [vmem:[#allocation2] sm:$0x1] %v11_v0 }
   0x3   :  { %v440_v1 = vld [vmem:[%s582_s2] sm:$0xff]   ;;  %vm56_vm0 = vcmask 130048   ;;  %v538_v3 = vld [vmem:[%s580_s0 + $0x8] sm:$0xff]  }
   0x4   :  { %v533_v2 = vld [vmem:[%s580_s0] sm:$0xff]   ;;  %390 = vmatprep.subr.bf16.mxu0 %v440_v1 }
   0x5   :  { %391 = vmatpush3.bf16.msra.mxu0 %v440_v1  ;;  %392 = vmatprep.mubr.msk.bf16.mxu0 %vm56_vm0, %v533_v2 }
   0x6   :  { %13 = vsyncpa [#allocation4], 0  ;;  %v116_v4 = vld [vmem:[%s584_s4] sm:$0xff]  ;;  %v117_v5 = vld [vmem:[%s584_s4 + $0x8] sm:$0xff]  ;;  %vm120_vm1 = vcmask 261120   ;;  %v485_v23 = vmov 0  }
   0x7   :  { %v118_v6 = vld [vmem:[%s584_s4 + $0x10] sm:$0xff]  ;;  %v426_v7 = vpack.c.bf16 %v117_v5, %v116_v4  ;;  %v119_v8 = vld [vmem:[%s584_s4 + $0x18] sm:$0xff]  ;;  %v360_v10 = vld [vmem:[%s583_s3] ss:$0 sm:$0xff]  ;;  %438 = vset.pattern.permute.xlu0 %v485_v23  ;;  %v486_v24 = vmov 0.0   ;;  %439 = vset.pattern.permute.xlu1 %v485_v23  ;;  %vm487_vm2 = vmmov 0  }
   0x8   :  { %393 = vmatmul.mubr.msk.bf16.vlgmr.msra.gmra.mrb[0].mxu0 %vm56_vm0, %v538_v3  ;;  %v430_v9 = vpack.c.bf16 %v119_v8, %v118_v6  ;;  %410 = vmatprep.subr.bf16.mxu0 %v486_v24  ;;  %v237_v44 = vld [vmem:[%s581_s1] sm:$0x1]  ;;  %s488_s1 = smov [#allocation3]   ;;  %vm344_vm3 = vcmask 123904  }
   0x9   :  { %427 = vmatprep.subr.bf16.mxu1 %v426_v7  ;;  %414 = vmatprep.mubr.msk.bf16.mxu0 %vm487_vm2, %v486_v24  ;;  %v370_v25 = vld [vmem:[#allocation2] ss:$0 sm:$0xff]  ;;  %s352_s12 = sshll.u32 %s488_s1, 4  ;;  %s353_s12 = int_to_ptr.vmem [resolvable:$true] %s352_s12 }
   0xa   :  { %429 = vmatpush3.bf16.msra.mxu1 %v426_v7  ;;  %s461_s13 = scalar_lea.vmem %s353_s12, 32  ;;  %p466_p1 = scmp.lt.s32.totalorder %s353_s12, %s353_s12 }
   0xb   :  { %431 = vmatprep.subr.bf16.mxu1 %v430_v9  ;;  %p462_p0 = scmp.ne.s32.totalorder %s353_s12, %s461_s13  ;;  %p467_p2 = scmp.lt.s32.totalorder %s461_s13, %s461_s13 }
   0xd   :  { %p468_p3 = por %p467_p2, %p466_p1 }
   0xe   :  { %433 = vmatpush3.bf16.msra.mxu1 %v430_v9 }
   0xf   :  { %418 = vmatprep.subr.bf16.mxu1 %v486_v24  ;;  %p469_p4 = pnand %p468_p3, %p462_p0 }
  0xdb   :  { %v394_v11 = vpop.f32.mrb[0].mxu0 }
  0xdc   :  { %v97_v12 = vpop.f32.mrb[1].mxu0  ;;  %v106_v15 = vadd.f32 %v394_v11, %v360_v10 }
  0xdd   :  { %v98_v13 = vadd.f32 %v360_v10, %v97_v12  ;;  %v395_v14 = vpop.f32.mrb[2].mxu0 }
  0xde   :  { %v100_v16 = vpop.f32.mrb[3].mxu0  ;;  %v109_v18 = vadd.f32 %v395_v14, %v360_v10 }
  0xdf   :  { %443 = vtanh.f32 %v98_v13  ;;  %v101_v17 = vadd.f32 %v360_v10, %v100_v16 }
  0xe1   :  { %445 = vtanh.f32 %v101_v17 }
  0xe2   :  { %447 = vtanh.f32 %v106_v15 }
  0xe3   :  { %449 = vtanh.f32 %v109_v18 }
  0xe9   :  { %v444_v19 = vpop.eup %443 }
  0xea   :  { %404 = vmatprep.mubr.msk.f32.mxu1 %vm120_vm1, %v444_v19 }
  0xeb   :  { %v446_v20 = vpop.eup %445 }
  0xec   :  { %v448_v21 = vpop.eup %447  ;;  %405 = vmatmul.mubr.msk.f32.vlgmr.msra.gmra.mrb[0].mxu1 %vm120_vm1, %v446_v20 }
  0xed   :  { %407 = vmatprep.mubr.msk.f32.mxu1 %vm120_vm1, %v448_v21  ;;  %v450_v22 = vpop.eup %449 }
  0xf0   :  { %408 = vmatmul.mubr.msk.f32.gmra.mrb[2].mxu1 %vm120_vm1, %v450_v22 }
  0xf1   :  { %422 = vmatprep.mubr.msk.bf16.mxu1 %vm487_vm2, %v486_v24 }
 0x1bf   :  { %v406_v26 = vpop.f32.mrb[0].mxu1 }
 0x1c0   :  { %v226_v27 = vsub.f32 %v406_v26, %v370_v25  ;;  %v199_v28 = vpop.f32.mrb[1].mxu1 }
 0x1c1   :  { %v225_v29 = vsub.f32 %v199_v28, %v370_v25 }
 0x1c2   :  { %v231_v30 = vmul.f32 1.442695, %v226_v27 }
 0x1c3   :  { %v229_v31 = vmul.f32 1.442695, %v225_v29  ;;  %v409_v32 = vpop.f32.mrb[2].mxu1 }
 0x1c4   :  { %451 = vpow2.f32 %v231_v30  ;;  %v228_v33 = vsub.f32 %v409_v32, %v370_v25  ;;  %v209_v34 = vpop.f32.mrb[3].mxu1 }
 0x1c5   :  { %453 = vpow2.f32 %v229_v31  ;;  %v227_v35 = vsub.f32 %v209_v34, %v370_v25 }
 0x1c6   :  { %v235_v36 = vmul.f32 1.442695, %v228_v33 }
 0x1c7   :  { %v233_v37 = vmul.f32 1.442695, %v227_v35 }
 0x1c8   :  { %455 = vpow2.f32 %v235_v36 }
 0x1c9   :  { %457 = vpow2.f32 %v233_v37 }
 0x1ce   :  { %v452_v38 = vpop.eup %451 }
 0x1cf   :  { %v454_v39 = vpop.eup %453 }
 0x1d0   :  { %v238_v40 = vpack.c.bf16 %v452_v38, %v454_v39 }
 0x1d2   :  { %v456_v41 = vpop.eup %455  ;;  %242 = vperm.xlu0 %438, %v238_v40   ;;  %419 = vmatpush3.bf16.msra.mxu1 %v238_v40 }
 0x1d3   :  { %v458_v42 = vpop.eup %457  ;;  %420 = vmatprep.subr.bf16.mxu1 %v486_v24 }
 0x1d4   :  { %v239_v43 = vpack.c.bf16 %v456_v41, %v458_v42 }
 0x1d6   :  { %247 = vperm.xlu0 %438, %v239_v43   ;;  %421 = vmatpush3.bf16.msra.mxu1 %v239_v43 }
 0x1d9   :  { %423 = vmatmul.mubr.msk.bf16.vlgmr.msra.gmra.mrb[4].mxu1 %vm120_vm1, %v237_v44 }
 0x251   :  { %v243_v45 = vpop.permute.xlu0 %242 }
 0x252   :  { %v252_v46 = vmul.bf16 %v533_v2, %v243_v45 }
 0x254   :  { %411 = vmatpush3.bf16.msra.mxu0 %v252_v46 }
 0x255   :  { %v248_v47 = vpop.permute.xlu0 %247  ;;  %412 = vmatprep.subr.bf16.mxu0 %v486_v24 }
 0x256   :  { %v253_v48 = vmul.bf16 %v538_v3, %v248_v47 }
 0x258   :  { %413 = vmatpush3.bf16.msra.mxu0 %v253_v48 }
 0x25b   :  { %415 = vmatmul.mubr.msk.bf16.vlgmr.msra.gmra.mrb[4].mxu0 %vm120_vm1, %v237_v44 }
 0x2ac   :  { %v331_v49 = vpop.f32.mrb[4].mxu1 }
 0x2ad   :  { %459 = vrcp.f32 %v331_v49  ;;  %v424_v50 = vpop.f32.mrb[5].mxu1 }
 0x2ae   :  { %v334_v51 = vpop.f32.mrb[6].mxu1 }
 0x2af   :  { %v425_v52 = vpop.f32.mrb[7].mxu1 }
 0x2b7   :  { %v460_v53 = vpop.eup %459 }
 0x2b8   :  { %340 = vperm.xlu1 %439, %v460_v53  }
 0x32e   :  { %v291_v54 = vpop.f32.mrb[4].mxu0 }
 0x32f   :  { %v416_v55 = vpop.f32.mrb[5].mxu0 }
 0x330   :  { %v294_v56 = vpop.f32.mrb[6].mxu0 }
 0x331   :  { %v417_v57 = vpop.f32.mrb[7].mxu0 }
 0x337   :  { %v341_v58 = vpop.permute.xlu1 %340 }
 0x338   :  { %v343_v59 = vmul.f32 %v341_v58, %v291_v54 }
 0x33a   :  { %345 = vst.msk [vmem:[#allocation3] sm:$0x3] %vm344_vm3, %v343_v59 }
 0x33b   :  { %472 = shalt.err (!%p469_p4)
}
 0x33c   :  { %s473_s16 = scalar_lea.hbm %s586_s6, 32 }
 0x33d   :  { %p474_p5 = scmp.ne.s32.totalorder %s586_s6, %s473_s16  ;;  %p477_p6 = scmp.lt.u32.totalorder %s473_s16, %s586_s6 }
 0x33f   :  { %p479_p7 = pnand %p477_p6, %p474_p5 }
 0x341   :  { %482 = shalt.err (!%p479_p7)
}
 0x342   :  { %355 = dma.vmem_to_hbm [thread:$0]  %s353_s12, 32, %s586_s6, [#allocation4]  }
 0x343   :  { %483 = dma.done.wait [#allocation4], 32  }
 0x344   :  { %484 = vsyncadd [#allocation4], 4294967264 }
 0x345   :  { %359 = vsyncpa [#allocation4], 1 }

</bundles_post_ra>
